<compile_context>
chip_gen: v7x
topology: tpu7x:2x2x1
jax: 0.10.0
libtpu: 0.0.40
codegen_flags: <defaults>
</compile_context>

<pallas_src>
import functools

import jax
import jax.numpy as jnp
from jax import lax
from jax.experimental import pallas as pl
from jax.experimental.pallas import tpu as pltpu


def _round_up(x, m):
    return (x + m - 1) // m * m


def _t5_bias_kernel(win_ref, o_ref, *, tq_sub, nsub, n_keys):
    """win_ref: (nsub, L_pad) windows for this head/supertile.
       o_ref  : (nsub * tq_sub, n_keys) output rows (n_keys = padded seq len)."""

    def body(s, carry):
        # One window vector per tq_sub-row sub-tile (dynamic sublane read).
        w = win_ref[pl.ds(s, 1), :]                       # (1, L_pad)
        base = s * tq_sub
        # Build groups of 8 rows so every store is a dense (8, n_keys) block.
        for g in range(tq_sub // 8):
            rows = []
            for r in range(8):
                a = g * 8 + r                             # row within sub-tile
                off = tq_sub - 1 - a                      # static lane offset
                rows.append(w[:, off:off + n_keys])       # (1, n_keys)
            block = jnp.concatenate(rows, axis=0)         # (8, n_keys)
            row0 = pl.multiple_of(base + g * 8, 8)
            o_ref[pl.ds(row0, 8), :] = block
        return carry

    lax.fori_loop(0, nsub, body, 0)


def _build_windows(table, n_pad, tq_sub, l_pad, max_distance, symmetric):
    """windows[h, s, m] = bias value for relative position (m - (tq_sub-1) - s*tq_sub)."""
    nb, _ = table.shape
    n_sub_total = n_pad // tq_sub
    s_idx = jnp.arange(n_sub_total, dtype=jnp.int32)[:, None]
    m_idx = jnp.arange(l_pad, dtype=jnp.int32)[None, :]
    rel = m_idx - (tq_sub - 1) - s_idx * tq_sub
    rel = jnp.clip(rel, -max_distance, max_distance - 1)
    if symmetric:
        idx = jnp.abs(rel)
    else:
        idx = rel + nb // 2
    idx = jnp.clip(idx, 0, nb - 1)
    win = jnp.take(table, idx, axis=0)                    # (n_sub_total, L_pad, H)
    return jnp.transpose(win, (2, 0, 1))                  # (H, n_sub_total, L_pad)


def t5_relative_attention_logit_bias(x, bias_values, *, max_distance=1000,
                                     symmetric=False):
    """x: (B, N, ...) -> bias (1, H, N, N).  bias_values: (num_buckets, H)."""
    # TODO(synk): bucketed relative positions (num_buckets > 0) are not
    # implemented; the reference module itself raises NotImplementedError there.
    n_seq = x.shape[1]
    nb, num_heads = bias_values.shape

    tq_sub = 32                      # rows expanded from one window
    nsub = 8                         # sub-tiles per grid step
    rows_per_step = tq_sub * nsub    # 256 query rows per grid step
    n_pad = _round_up(max(n_seq, rows_per_step), rows_per_step)
    l_pad = _round_up(n_pad + tq_sub - 1, 128)
    n_super = n_pad // rows_per_step

    windows = _build_windows(bias_values, n_pad, tq_sub, l_pad,
                             max_distance, symmetric)     # (H, n_sub_total, L_pad)

    itemsize = jnp.dtype(bias_values.dtype).itemsize
    block_bytes = (rows_per_step * n_pad + nsub * l_pad) * itemsize
    vmem_limit = int(min(110 * 2**20, max(32 * 2**20, 6 * block_bytes)))

    kernel = functools.partial(_t5_bias_kernel, tq_sub=tq_sub, nsub=nsub,
                               n_keys=n_pad)

    out = pl.pallas_call(
        kernel,
        out_shape=jax.ShapeDtypeStruct((num_heads, n_pad, n_pad),
                                       bias_values.dtype),
        grid=(num_heads, n_super),
        in_specs=[
            pl.BlockSpec((None, nsub, l_pad), lambda h, s: (h, s, 0)),
        ],
        out_specs=pl.BlockSpec((None, rows_per_step, n_pad),
                               lambda h, s: (h, s, 0)),
        compiler_params=pltpu.CompilerParams(
            dimension_semantics=("parallel", "parallel"),
            vmem_limit_bytes=vmem_limit),
    )(windows)

    return out[:, :n_seq, :n_seq][None]                   # (1, H, N, N)


def _reference(x, table, max_distance, symmetric):
    """Pure-JAX reference mirroring the PyTorch module."""
    n_seq = x.shape[1]
    ctx = jnp.arange(n_seq)[:, None]
    mem = jnp.arange(n_seq)[None, :]
    rel = mem - ctx
    rel = jnp.clip(rel, -max_distance, max_distance - 1)
    if symmetric:
        idx = jnp.abs(rel)
    else:
        idx = rel + table.shape[0] // 2
    bias = table[idx]                                     # (N, N, H)
    return jnp.transpose(bias, (2, 0, 1))[None]           # (1, H, N, N)


if __name__ == "__main__":
    key = jax.random.PRNGKey(0)
    B, N, feat = 2, 16, 32
    num_heads = 4
    max_distance = 64
    symmetric = False
    num_buckets = max_distance * (1 if symmetric else 2)

    k1, k2 = jax.random.split(key)
    x = jax.random.normal(k1, (B, N, feat), dtype=jnp.float32)
    bias_values = 0.02 * jax.random.normal(
        k2, (num_buckets, num_heads), dtype=jnp.float32)

    out = t5_relative_attention_logit_bias(
        x, bias_values, max_distance=max_distance, symmetric=symmetric)
    out = jax.block_until_ready(out)

    ref = _reference(x, bias_values, max_distance, symmetric)
    assert out.shape == (1, num_heads, N, N), out.shape
    assert jnp.allclose(out, ref, atol=1e-6, rtol=0), "mismatch vs reference"

    print("KERNEL_OK")
</pallas_src>

<mosaic_0001>
module attributes {stable_mosaic.version = 11 : i64} {
  func.func @_t5_bias_kernel(%arg0: i32, %arg1: i32, %arg2: memref<1x8x384xf32, #tpu.memory_space<vmem>>, %arg3: memref<1x256x256xf32, #tpu.memory_space<vmem>>) attributes {dimension_semantics = [#tpu.dimension_semantics<parallel>, #tpu.dimension_semantics<parallel>], iteration_bounds = array<i64: 4, 1>, scalar_prefetch = 0 : i64, scratch_operands = 0 : i64, tpu.core_type = #tpu.core_type<tc>, window_params = [{transform_indices = @transform_0, window_bounds = array<i64: 1, 8, 384>}, {transform_indices = @transform_1, window_bounds = array<i64: 1, 256, 256>}]} {
    %c0_i32 = arith.constant 0 : i32
    %c8_i32 = arith.constant 8 : i32
    %0 = arith.addi %c0_i32, %c8_i32 : i32
    %c1_i32 = arith.constant 1 : i32
    scf.for %arg4 = %c0_i32 to %0 step %c1_i32  : i32 {
      %c0 = arith.constant 0 : index
      %1 = arith.index_cast %arg4 : i32 to index
      %c0_1 = arith.constant 0 : index
      %2 = vector.load %arg2[%c0, %1, %c0_1] : memref<1x8x384xf32, #tpu.memory_space<vmem>>, vector<1x1x384xf32>
      %3 = vector.shape_cast %2 : vector<1x1x384xf32> to vector<1x384xf32>
      %c32_i32 = arith.constant 32 : i32
      %4 = arith.muli %arg4, %c32_i32 : i32
      %5 = vector.extract_strided_slice %3 {offsets = [0, 31], sizes = [1, 256], strides = [1, 1]} : vector<1x384xf32> to vector<1x256xf32>
      %6 = vector.extract_strided_slice %3 {offsets = [0, 30], sizes = [1, 256], strides = [1, 1]} : vector<1x384xf32> to vector<1x256xf32>
      %7 = vector.extract_strided_slice %3 {offsets = [0, 29], sizes = [1, 256], strides = [1, 1]} : vector<1x384xf32> to vector<1x256xf32>
      %8 = vector.extract_strided_slice %3 {offsets = [0, 28], sizes = [1, 256], strides = [1, 1]} : vector<1x384xf32> to vector<1x256xf32>
      %9 = vector.extract_strided_slice %3 {offsets = [0, 27], sizes = [1, 256], strides = [1, 1]} : vector<1x384xf32> to vector<1x256xf32>
      %10 = vector.extract_strided_slice %3 {offsets = [0, 26], sizes = [1, 256], strides = [1, 1]} : vector<1x384xf32> to vector<1x256xf32>
      %11 = vector.extract_strided_slice %3 {offsets = [0, 25], sizes = [1, 256], strides = [1, 1]} : vector<1x384xf32> to vector<1x256xf32>
      %12 = vector.extract_strided_slice %3 {offsets = [0, 24], sizes = [1, 256], strides = [1, 1]} : vector<1x384xf32> to vector<1x256xf32>
      %13 = tpu.concatenate %5, %6, %7, %8, %9, %10, %11, %12 in 0 : vector<1x256xf32>, vector<1x256xf32>, vector<1x256xf32>, vector<1x256xf32>, vector<1x256xf32>, vector<1x256xf32>, vector<1x256xf32>, vector<1x256xf32> -> vector<8x256xf32>
      %c0_i32_2 = arith.constant 0 : i32
      %14 = arith.addi %4, %c0_i32_2 : i32
      %15 = tpu.assume_multiple %14, 8 : i32
      %c0_3 = arith.constant 0 : index
      %16 = arith.index_cast %15 : i32 to index
      %c0_4 = arith.constant 0 : index
      %17 = vector.load %arg3[%c0_3, %16, %c0_4] : memref<1x256x256xf32, #tpu.memory_space<vmem>>, vector<1x8x256xf32>
      %18 = vector.shape_cast %17 : vector<1x8x256xf32> to vector<8x256xf32>
      %19 = vector.shape_cast %13 : vector<8x256xf32> to vector<1x8x256xf32>
      tpu.vector_store %arg3[%c0_3, %16, %c0_4], %19 {strides = array<i32>} : memref<1x256x256xf32, #tpu.memory_space<vmem>>, vector<1x8x256xf32>,
      %20 = vector.extract_strided_slice %3 {offsets = [0, 23], sizes = [1, 256], strides = [1, 1]} : vector<1x384xf32> to vector<1x256xf32>
      %21 = vector.extract_strided_slice %3 {offsets = [0, 22], sizes = [1, 256], strides = [1, 1]} : vector<1x384xf32> to vector<1x256xf32>
      %22 = vector.extract_strided_slice %3 {offsets = [0, 21], sizes = [1, 256], strides = [1, 1]} : vector<1x384xf32> to vector<1x256xf32>
      %23 = vector.extract_strided_slice %3 {offsets = [0, 20], sizes = [1, 256], strides = [1, 1]} : vector<1x384xf32> to vector<1x256xf32>
      %24 = vector.extract_strided_slice %3 {offsets = [0, 19], sizes = [1, 256], strides = [1, 1]} : vector<1x384xf32> to vector<1x256xf32>
      %25 = vector.extract_strided_slice %3 {offsets = [0, 18], sizes = [1, 256], strides = [1, 1]} : vector<1x384xf32> to vector<1x256xf32>
      %26 = vector.extract_strided_slice %3 {offsets = [0, 17], sizes = [1, 256], strides = [1, 1]} : vector<1x384xf32> to vector<1x256xf32>
      %27 = vector.extract_strided_slice %3 {offsets = [0, 16], sizes = [1, 256], strides = [1, 1]} : vector<1x384xf32> to vector<1x256xf32>
      %28 = tpu.concatenate %20, %21, %22, %23, %24, %25, %26, %27 in 0 : vector<1x256xf32>, vector<1x256xf32>, vector<1x256xf32>, vector<1x256xf32>, vector<1x256xf32>, vector<1x256xf32>, vector<1x256xf32>, vector<1x256xf32> -> vector<8x256xf32>
      %c8_i32_5 = arith.constant 8 : i32
      %29 = arith.addi %4, %c8_i32_5 : i32
      %30 = tpu.assume_multiple %29, 8 : i32
      %c0_6 = arith.constant 0 : index
      %31 = arith.index_cast %30 : i32 to index
      %c0_7 = arith.constant 0 : index
      %32 = vector.load %arg3[%c0_6, %31, %c0_7] : memref<1x256x256xf32, #tpu.memory_space<vmem>>, vector<1x8x256xf32>
      %33 = vector.shape_cast %32 : vector<1x8x256xf32> to vector<8x256xf32>
      %34 = vector.shape_cast %28 : vector<8x256xf32> to vector<1x8x256xf32>
      tpu.vector_store %arg3[%c0_6, %31, %c0_7], %34 {strides = array<i32>} : memref<1x256x256xf32, #tpu.memory_space<vmem>>, vector<1x8x256xf32>,
      %35 = vector.extract_strided_slice %3 {offsets = [0, 15], sizes = [1, 256], strides = [1, 1]} : vector<1x384xf32> to vector<1x256xf32>
      %36 = vector.extract_strided_slice %3 {offsets = [0, 14], sizes = [1, 256], strides = [1, 1]} : vector<1x384xf32> to vector<1x256xf32>
      %37 = vector.extract_strided_slice %3 {offsets = [0, 13], sizes = [1, 256], strides = [1, 1]} : vector<1x384xf32> to vector<1x256xf32>
      %38 = vector.extract_strided_slice %3 {offsets = [0, 12], sizes = [1, 256], strides = [1, 1]} : vector<1x384xf32> to vector<1x256xf32>
      %39 = vector.extract_strided_slice %3 {offsets = [0, 11], sizes = [1, 256], strides = [1, 1]} : vector<1x384xf32> to vector<1x256xf32>
      %40 = vector.extract_strided_slice %3 {offsets = [0, 10], sizes = [1, 256], strides = [1, 1]} : vector<1x384xf32> to vector<1x256xf32>
      %41 = vector.extract_strided_slice %3 {offsets = [0, 9], sizes = [1, 256], strides = [1, 1]} : vector<1x384xf32> to vector<1x256xf32>
      %42 = vector.extract_strided_slice %3 {offsets = [0, 8], sizes = [1, 256], strides = [1, 1]} : vector<1x384xf32> to vector<1x256xf32>
      %43 = tpu.concatenate %35, %36, %37, %38, %39, %40, %41, %42 in 0 : vector<1x256xf32>, vector<1x256xf32>, vector<1x256xf32>, vector<1x256xf32>, vector<1x256xf32>, vector<1x256xf32>, vector<1x256xf32>, vector<1x256xf32> -> vector<8x256xf32>
      %c16_i32 = arith.constant 16 : i32
      %44 = arith.addi %4, %c16_i32 : i32
      %45 = tpu.assume_multiple %44, 8 : i32
      %c0_8 = arith.constant 0 : index
      %46 = arith.index_cast %45 : i32 to index
      %c0_9 = arith.constant 0 : index
      %47 = vector.load %arg3[%c0_8, %46, %c0_9] : memref<1x256x256xf32, #tpu.memory_space<vmem>>, vector<1x8x256xf32>
      %48 = vector.shape_cast %47 : vector<1x8x256xf32> to vector<8x256xf32>
      %49 = vector.shape_cast %43 : vector<8x256xf32> to vector<1x8x256xf32>
      tpu.vector_store %arg3[%c0_8, %46, %c0_9], %49 {strides = array<i32>} : memref<1x256x256xf32, #tpu.memory_space<vmem>>, vector<1x8x256xf32>,
      %50 = vector.extract_strided_slice %3 {offsets = [0, 7], sizes = [1, 256], strides = [1, 1]} : vector<1x384xf32> to vector<1x256xf32>
      %51 = vector.extract_strided_slice %3 {offsets = [0, 6], sizes = [1, 256], strides = [1, 1]} : vector<1x384xf32> to vector<1x256xf32>
      %52 = vector.extract_strided_slice %3 {offsets = [0, 5], sizes = [1, 256], strides = [1, 1]} : vector<1x384xf32> to vector<1x256xf32>
      %53 = vector.extract_strided_slice %3 {offsets = [0, 4], sizes = [1, 256], strides = [1, 1]} : vector<1x384xf32> to vector<1x256xf32>
      %54 = vector.extract_strided_slice %3 {offsets = [0, 3], sizes = [1, 256], strides = [1, 1]} : vector<1x384xf32> to vector<1x256xf32>
      %55 = vector.extract_strided_slice %3 {offsets = [0, 2], sizes = [1, 256], strides = [1, 1]} : vector<1x384xf32> to vector<1x256xf32>
      %56 = vector.extract_strided_slice %3 {offsets = [0, 1], sizes = [1, 256], strides = [1, 1]} : vector<1x384xf32> to vector<1x256xf32>
      %57 = vector.extract_strided_slice %3 {offsets = [0, 0], sizes = [1, 256], strides = [1, 1]} : vector<1x384xf32> to vector<1x256xf32>
      %58 = tpu.concatenate %50, %51, %52, %53, %54, %55, %56, %57 in 0 : vector<1x256xf32>, vector<1x256xf32>, vector<1x256xf32>, vector<1x256xf32>, vector<1x256xf32>, vector<1x256xf32>, vector<1x256xf32>, vector<1x256xf32> -> vector<8x256xf32>
      %c24_i32 = arith.constant 24 : i32
      %59 = arith.addi %4, %c24_i32 : i32
      %60 = tpu.assume_multiple %59, 8 : i32
      %c0_10 = arith.constant 0 : index
      %61 = arith.index_cast %60 : i32 to index
      %c0_11 = arith.constant 0 : index
      %62 = vector.load %arg3[%c0_10, %61, %c0_11] : memref<1x256x256xf32, #tpu.memory_space<vmem>>, vector<1x8x256xf32>
      %63 = vector.shape_cast %62 : vector<1x8x256xf32> to vector<8x256xf32>
      %64 = vector.shape_cast %58 : vector<8x256xf32> to vector<1x8x256xf32>
      tpu.vector_store %arg3[%c0_10, %61, %c0_11], %64 {strides = array<i32>} : memref<1x256x256xf32, #tpu.memory_space<vmem>>, vector<1x8x256xf32>,
    }
    %c8_i32_0 = arith.constant 8 : i32
    return
  }
  func.func @transform_0(%arg0: i32, %arg1: i32) -> (i32, i32, i32) {
    %c0_i32 = arith.constant 0 : i32
    %c0_i32_0 = arith.constant 0 : i32
    return %arg0, %arg1, %c0_i32 : i32, i32, i32
  }
  func.func @transform_1(%arg0: i32, %arg1: i32) -> (i32, i32, i32) {
    %c0_i32 = arith.constant 0 : i32
    %c0_i32_0 = arith.constant 0 : i32
    return %arg0, %arg1, %c0_i32 : i32, i32, i32
  }
}

</mosaic_0001>

<bundles_post_ra>
// kernel: tpu_custom_call.1
= control target key start
LH: loop header
LB: loop body
LE: loop exit
PB: predicated region body
PF: predicated region fallthrough
CT: control target
= control target key end

     0   :  { %6 = vsyncpa [#allocation3], 0  ;;  %s1000_s0 = inlined_call_operand.hbm [shape: f32[4,8,384], index: 0, kind: input, shape index: {}]   ;;  %s1001_s1 = inlined_call_operand.hbm [shape: f32[4,256,256], index: 1, kind: output, shape index: {}]  }
   0x1   :  { %8 = vsyncpa [#allocation3 + $0x1], 0 }
   0x2   :  { %9 = vsyncpa [#allocation4], 0 }
   0x3   :  { %11 = vsyncpa [#allocation4 + $0x1], 0  ;;  %s757_s6 = smov 0   ;;  %s759_s7 = smov 0  }
   0x4   :  { %s761_s8 = smov 0   ;;  %s763_s9 = smov 0  }
   0x5   :  { %s765_s10 = smov 0   ;;  %s767_s11 = smov 0  }
   0x6 LB: > { %s497_s12 = sadd.s32 4294967295, %s726_s11   ;;  %s498_s13 = sadd.s32 4294967294, %s726_s11   ;;  %s726_s11 = sphi %s767_s11, %s17_s11   ;;  %s722_s10 = sphi %s765_s10, %s1015_s10   ;;  %s718_s9 = sphi %s763_s9, %s1014_s9   ;;  %s714_s8 = sphi %s761_s8, %s1013_s8   ;;  %s710_s7 = sphi %s759_s7, %s1012_s7   ;;  %s706_s6 = sphi %s757_s6, %s1011_s6  }
   0x7   : > { %s29_s14 = sadd.s32 1, %s722_s10  ;;  %s38_s15 = sadd.s32 1, %s714_s8 }
   0x8   : > { %p31_p0 = scmp.ge.s32.totalorder %s29_s14, 4  ;;  %p45_p1 = scmp.ne.s32.totalorder %s714_s8, %s710_s7 }
   0x9   : > { %p46_p2 = scmp.eq.s32.totalorder %s726_s11, 0  ;;  %p51_p3 = scmp.ne.s32.totalorder %s710_s7, %s706_s6 }
   0xa   : > { %s1017_s14 = smov (%p31_p0, %s29_s14), 0  ;;  %p52_p5 = scmp.eq.s32.totalorder %s497_s12, 0 }
   0xb   : > { %p798_p4 = por %p46_p2, %p45_p1  ;;  %s33_s17 = ssub.s32 %s722_s10, %s1017_s14 }
   0xc   : > { %p77_p6 = scmp.eq.s32.totalorder %s497_s12, 3  ;;  %p36_p7 = scmp.eq.s32.totalorder %s33_s17, 0 }
   0xd   : > { %p804_p8 = por %p52_p5, %p51_p3  ;;  %p83_p10 = scmp.eq.s32.totalorder %s498_s13, 3 }
   0xe   : > { %p808_p9 = por %p77_p6, %p45_p1  ;;  %p539_p12 = scmp.lt.s32.totalorder %s726_s11, 4 }
   0xf   : > { %s813_s20 = scalar_select %p36_p7, %s714_s8, %s38_s15  }
  0x10   : > { %s1005_s19 = scalar_select %p808_p9, 1, 0 }
  0x11   : > { %p815_p11 = por %p83_p10, %p51_p3  ;;  %s103_s22 = sand.u32 1, %s714_s8  }
  0x12   : > { %s524_s23 = smul.u32 24, %s103_s22  ;;  %p824_p13 = pnand %p539_p12, %p798_p4 }
  0x13   : > { %s1006_s21 = scalar_select %p815_p11, 1, 0 }
  0x14   : > { %s525_s24 = smul.u32 384, %s722_s10  ;;  %s107_s29 = scalar_lea.vmem [#allocation2], %s524_s23 }
  0x15   : > { %s117_s30 = sshll.u32 %s107_s29, 4  ;;  %s104_s2 = scalar_lea.sflag [#allocation3], %s103_s22  ;;  %s834_s30 = int_to_ptr.vmem [resolvable:$true] %s117_s30 }
  0x16   : > { %s832_s28 = scalar_lea.hbm %s1000_s0, %s525_s24  ;;  %p612_p2 = pneg %p824_p13 }
  0x17   : > { %s610_s3 = scalar_lea.hbm %s832_s28, 384  ;;  %s615_s12 = scalar_lea.hbm %s1000_s0, 1536 }
  0x18   : > { %p611_p1 = scmp.ne.s32.totalorder %s832_s28, %s610_s3  ;;  %p616_p5 = scmp.lt.u32.totalorder %s832_s28, %s1000_s0 }
  0x19   : > { %p617_p6 = scmp.lt.u32.totalorder %s615_s12, %s610_s3  ;;  %p619_p10 = scmp.lt.u32.totalorder %s610_s3, %s832_s28 }
  0x1a   : > { %p613_p3 = pnand %p612_p2, %p611_p1 }
  0x1b   : > { %p618_p7 = por %p617_p6, %p616_p5 }
  0x1c   : > { %p614_p4 = pneg %p613_p3 }
  0x1d   : > { %p620_p12 = por %p619_p10, %p618_p7 }
  0x1f   : > { %p621_p0 = pnand %p620_p12, %p614_p4 }
  0x21   : > { %624 = shalt.err (!%p621_p0)
}
  0x22   : > { %s625_s16 = scalar_lea.vmem %s834_s30, 384  ;;  %s732_s17 = smov [#allocation2]  }
  0x23   : > { %p626_p1 = scmp.ne.s32.totalorder %s834_s30, %s625_s16  ;;  %s630_s22 = sshll.u32 %s732_s17, 4  ;;  %s631_s22 = int_to_ptr.vmem [resolvable:$false] %s630_s22 }
  0x24   : > { %s632_s23 = scalar_lea.vmem %s631_s22, 768  ;;  %p633_p9 = scmp.lt.s32.totalorder %s834_s30, %s631_s22 }
  0x25   : > { %p628_p3 = pnand %p626_p1, %p612_p2  ;;  %p634_p5 = scmp.lt.s32.totalorder %s632_s23, %s625_s16 }
  0x27   : > { %p629_p11 = pneg %p628_p3  ;;  %p635_p6 = por %p634_p5, %p633_p9 }
  0x29   : > { %p636_p7 = pnand %p635_p6, %p629_p11 }
  0x2b   : > { %639 = shalt.err (!%p636_p7)
}
  0x2c   : > { %534 = dma.hbm_to_vmem [thread:$0]  (!%p824_p13), %s832_s28, 384, %s834_s30, %s104_s2  }
  0x2d   : > { %p122_p0 = scmp.lt.s32.totalorder %s726_s11, 5  ;;  %p1008_p4 = scmp.ge.s32.totalorder %s726_s11, 1 }
  0x2f   : > { %p123_p2 = pnand %p1008_p4, %p122_p0 }
  0x30   : > { %s865_s24 = sand.u32 (!%p123_p2), 1, %s710_s7  }
  0x31   : > { %126 = sbr.rel (%p123_p2) target bundleno = 370 (0x172), region = 24  ;;  %s129_s27 = scalar_lea.sflag (!%p123_p2), [#allocation3], %s865_s24 }
  0x32   : > { %s526_s26 = smul.u32 (!%p123_p2), 24, %s865_s24 }
  0x34   : > { %s869_s29 = scalar_lea.vmem (!%p123_p2), [#allocation2], %s526_s26 }
  0x38   : > { %697 = dma.done.wait (%p804_p8), %s129_s27, 384  }
  0x39   : > { %699 = vsyncadd (%p804_p8), %s129_s27, 4294966912  ;;  %s503_s25 = sshll.u32 %s865_s24, 9  ;;  %s878_s30 = smov 0  }
  0x3a   : > { %s876_s28 = scalar_lea.vmem [#allocation5], %s503_s25 }
  0x3b LB: >> { %v169_v0 = vlaneseq  ;;  %s158_s2 = sshra.s32 %s730_s30, 3  ;;  %s161_s3 = sand.u32 7, %s730_s30  ;;  %vm268_vm0 = vcmask 1040384   ;;  %vm272_vm1 = vcmask 1041408   ;;  %vm276_vm2 = vcmask 1042432   ;;  %s730_s30 = sphi %s878_s30, %s157_s30  }
  0x3c   : >> { %s504_s18 = smul.u32 24, %s158_s2  ;;  %s733_s12 = smov 1   ;;  %vm280_vm3 = vcmask 1043456   ;;  %vm190_vm4 = vcmask 7168   ;;  %vm284_vm5 = vcmask 1044480   ;;  %vm202_vm6 = vcmask 15360  }
  0x3d   : >> { %v170_v1 = vshrl.u32 %v169_v0, 7  ;;  %s734_s13 = smov 2   ;;  %s735_s15 = smov 3   ;;  %vm288_vm7 = vcmask 1045504   ;;  %vm214_vm8 = vcmask 23552   ;;  %vm292_vm9 = vcmask 1046528  }
  0x3e   : >> { %s164_s4 = sadd.s32 %s504_s18, %s161_s3  ;;  %s736_s16 = smov 4   ;;  %vm226_vm10 = vcmask 31744   ;;  %vm238_vm11 = vcmask 39936   ;;  %vm250_vm12 = vcmask 48128   ;;  %vm262_vm13 = vcmask 56320  }
  0x3f   : >> { %v179_v2 = vsub.s32 2, %v170_v1  ;;  %v171_v3 = vsub.s32 0, %v170_v1  ;;  %s165_s5 = scalar_lea.vmem %s869_s29, %s164_s4 [#allocation2]  ;;  %v175_v4 = vsub.s32 1, %v170_v1  ;;  %s737_s17 = smov 5   ;;  %vm305_vm14 = vcmask 793600  }
  0x40   : >> { %v166_v5 = vld [vmem:[%s165_s5] ss:$8 sm:$0x7]  ;;  %s738_s22 = smov 6   ;;  %s739_s23 = smov 7   ;;  %vm324_vm15 = vcmask 859136  }
  0x41   : >> { %v886_v6 = vrot.slane %v166_v5, %v179_v2  ;;  %v172_v7 = vrot.slane %v166_v5, %v171_v3  ;;  %v889_v8 = vrot.slane %v166_v5, %v175_v4  ;;  %s740_s26 = smov 105   ;;  %s741_s27 = smov 97  }
  0x42   : >> { %s742_s25 = smov 121   ;;  %s743_s2 = smov 113  }
  0x43   : >> { %188 = vrot.lane.b32.xlu1 %v886_v6, %s733_s12  ;;  %184 = vrot.lane.b32.xlu0 %v172_v7, %s733_s12  ;;  %s505_s3 = sshll.u32 %s730_s30, 5  ;;  %s157_s30 = sadd.s32 1, %s730_s30  }
  0x44   : >> { %s310_s18 = sshra.s32 %s505_s3, 3  ;;  %s317_s4 = sadd.s32 8, %s505_s3 }
  0x45   : >> { %s519_s5 = sshll.u32 %s310_s18, 4  ;;  %p154_p8 = scmp.ge.s32.totalorder %s157_s30, 8  }
  0x46   : > { %s523_s18 = sshll.u32 (%p154_p8), %s718_s9, 13  ;;  %p1009_p11 = scmp.ne.s32.totalorder (%p154_p8), %s1005_s19, 0 }
  0x47   : >> { %196 = vrot.lane.b32.xlu1 %v172_v7, %s734_s13  ;;  %186 = vrot.lane.b32.xlu0 %v889_v8, %s733_s12  ;;  %s329_s12 = sshra.s32 %s317_s4, 3  ;;  %s744_s29 = smov (%p154_p8), [#allocation5]  }
  0x48   : > { %s644_s30 = sshll.u32 (%p154_p8), %s744_s29, 4  ;;  %s645_s30 = int_to_ptr.vmem [resolvable:$false] %s644_s30 }
  0x49   : > { %s646_s9 = scalar_lea.vmem (%p154_p8), %s645_s30, 16384 }
  0x4b   : >> { %200 = vrot.lane.b32.xlu1 %v886_v6, %s734_s13  ;;  %198 = vrot.lane.b32.xlu0 %v889_v8, %s734_s13  ;;  %s336_s13 = sadd.s32 16, %s505_s3 }
  0x4f   : >> { %210 = vrot.lane.b32.xlu1 %v889_v8, %s735_s15  ;;  %208 = vrot.lane.b32.xlu0 %v172_v7, %s735_s15 }
  0x53   : >> { %220 = vrot.lane.b32.xlu1 %v172_v7, %s736_s16  ;;  %212 = vrot.lane.b32.xlu0 %v886_v6, %s735_s15  ;;  %s314_s15 = scalar_lea.vmem %s876_s28, %s519_s5 [#allocation5] }
  0x57   : >> { %224 = vrot.lane.b32.xlu1 %v886_v6, %s736_s16  ;;  %222 = vrot.lane.b32.xlu0 %v889_v8, %s736_s16  ;;  %s520_s16 = sshll.u32 %s329_s12, 4  ;;  %s949_s12 = scalar_lea.hbm (%p154_p8), %s1001_s1, %s523_s18 }
  0x5b   : >> { %234 = vrot.lane.b32.xlu1 %v889_v8, %s737_s17  ;;  %232 = vrot.lane.b32.xlu0 %v172_v7, %s737_s17 }
  0x5f   : >> { %244 = vrot.lane.b32.xlu1 %v172_v7, %s738_s22  ;;  %236 = vrot.lane.b32.xlu0 %v886_v6, %s737_s17  ;;  %s348_s17 = sshra.s32 %s336_s13, 3  ;;  %s394_s13 = sshll.u32 (%p154_p8), %s876_s28, 4  ;;  %s952_s13 = int_to_ptr.vmem [resolvable:$true] %s394_s13 }
  0x60   : > { %p647_p12 = scmp.lt.s32.totalorder (%p154_p8), %s952_s13, %s645_s30 }
  0x63   : >> { %248 = vrot.lane.b32.xlu1 %v886_v6, %s738_s22  ;;  %246 = vrot.lane.b32.xlu0 %v889_v8, %s738_s22  ;;  %s357_s22 = sadd.s32 24, %s505_s3 }
  0x67   : >> { %258 = vrot.lane.b32.xlu1 %v889_v8, %s739_s23  ;;  %256 = vrot.lane.b32.xlu0 %v172_v7, %s739_s23 }
  0x6b   : >> { %260 = vrot.lane.b32.xlu0 %v886_v6, %s739_s23  ;;  %s333_s23 = scalar_lea.vmem %s876_s28, %s520_s16 [#allocation5]  ;;  %s640_s16 = scalar_lea.vmem (%p154_p8), %s952_s13, 8192 }
  0x6c   : > { %p641_p9 = scmp.ne.s32.totalorder (%p154_p8), %s952_s13, %s640_s16  ;;  %p648_p1 = scmp.lt.s32.totalorder (%p154_p8), %s646_s9, %s640_s16 }
  0x6e   : > { %p642_p13 = pnand (%p154_p8), %p641_p9, %p1009_p11  ;;  %p649_p3 = por (%p154_p8), %p648_p1, %p647_p12 }
  0x70   : > { %p643_p10 = pneg (%p154_p8), %p642_p13 }
  0x72   : > { %p650_p5 = pnand (%p154_p8), %p649_p3, %p643_p10 }
  0xb5   : >> { %v189_v9 = vpop.permute.xlu1 %188  ;;  %v185_v10 = vpop.permute.xlu0 %184 }
  0xb6   : >> { %v269_v25 = vsel %vm268_vm0, %v172_v7, %v185_v10 }
  0xb9   : >> { %v197_v11 = vpop.permute.xlu1 %196  ;;  %v187_v12 = vpop.permute.xlu0 %186 }
  0xba   : >> { %v273_v26 = vsel %vm272_vm1, %v269_v25, %v197_v11  ;;  %v191_v31 = vsel %vm190_vm4, %v185_v10, %v187_v12  ;;  %v192_v33 = vsel %vm190_vm4, %v187_v12, %v189_v9 }
  0xbb   : >> { %v270_v40 = vsel %vm268_vm0, %v889_v8, %v191_v31  ;;  %v271_v43 = vsel %vm268_vm0, %v886_v6, %v192_v33  ;;  %vm343_vm0 = vcmask 924672  }
  0xbd   : >> { %v201_v13 = vpop.permute.xlu1 %200  ;;  %v199_v14 = vpop.permute.xlu0 %198 }
  0xbe   : >> { %v203_v34 = vsel %vm202_vm6, %v197_v11, %v199_v14  ;;  %v204_v37 = vsel %vm202_vm6, %v199_v14, %v201_v13 }
  0xbf   : >> { %v274_v44 = vsel %vm272_vm1, %v270_v40, %v203_v34  ;;  %v275_v47 = vsel %vm272_vm1, %v271_v43, %v204_v37  ;;  %vm365_vm1 = vcmask 990208  }
  0xc1   : >> { %v211_v15 = vpop.permute.xlu1 %210  ;;  %v209_v16 = vpop.permute.xlu0 %208 }
  0xc2   : >> { %v277_v28 = vsel %vm276_vm2, %v273_v26, %v209_v16  ;;  %v215_v38 = vsel %vm214_vm8, %v209_v16, %v211_v15 }
  0xc3   : >> { %v278_v48 = vsel %vm276_vm2, %v274_v44, %v215_v38 }
  0xc5   : >> { %v221_v17 = vpop.permute.xlu1 %220  ;;  %v213_v18 = vpop.permute.xlu0 %212 }
  0xc6   : >> { %v281_v30 = vsel %vm280_vm3, %v277_v28, %v221_v17  ;;  %v216_v41 = vsel %vm214_vm8, %v211_v15, %v213_v18 }
  0xc7   : >> { %v279_v52 = vsel %vm276_vm2, %v275_v47, %v216_v41 }
  0xc9   : >> { %v225_v19 = vpop.permute.xlu1 %224  ;;  %v223_v20 = vpop.permute.xlu0 %222 }
  0xca   : >> { %v227_v42 = vsel %vm226_vm10, %v221_v17, %v223_v20  ;;  %v228_v45 = vsel %vm226_vm10, %v223_v20, %v225_v19 }
  0xcb   : >> { %v282_v53 = vsel %vm280_vm3, %v278_v48, %v227_v42  ;;  %v283_v56 = vsel %vm280_vm3, %v279_v52, %v228_v45 }
  0xcd   : >> { %v235_v21 = vpop.permute.xlu1 %234  ;;  %v233_v22 = vpop.permute.xlu0 %232 }
  0xce   : >> { %v285_v32 = vsel %vm284_vm5, %v281_v30, %v233_v22  ;;  %v239_v49 = vsel %vm238_vm11, %v233_v22, %v235_v21 }
  0xcf   : >> { %v286_v59 = vsel %vm284_vm5, %v282_v53, %v239_v49 }
  0xd1   : >> { %v245_v23 = vpop.permute.xlu1 %244  ;;  %v237_v24 = vpop.permute.xlu0 %236 }
  0xd2   : >> { %v289_v35 = vsel %vm288_vm7, %v285_v32, %v245_v23  ;;  %v240_v50 = vsel %vm238_vm11, %v235_v21, %v237_v24 }
  0xd3   : >> { %v287_v60 = vsel %vm284_vm5, %v283_v56, %v240_v50 }
  0xd5   : >> { %v247_v27 = vpop.permute.xlu0 %246  ;;  %v249_v29 = vpop.permute.xlu1 %248 }
  0xd6   : >> { %v251_v54 = vsel %vm250_vm12, %v245_v23, %v247_v27  ;;  %v252_v55 = vsel %vm250_vm12, %v247_v27, %v249_v29 }
  0xd7   : >> { %v290_v61 = vsel %vm288_vm7, %v286_v59, %v251_v54  ;;  %v291_v62 = vsel %vm288_vm7, %v287_v60, %v252_v55 }
  0xd9   : >> { %v257_v36 = vpop.permute.xlu0 %256  ;;  %v259_v46 = vpop.permute.xlu1 %258 }
  0xda   : >> { %v293_v39 = vsel %vm292_vm9, %v289_v35, %v257_v36  ;;  %v263_v57 = vsel %vm262_vm13, %v257_v36, %v259_v46  ;;  %v356_v1 = vsel %vm292_vm9, %v291_v62, %v259_v46 }
  0xdb   : >> { %318 = vrot.lane.b32.xlu0 %v293_v39, %s740_s26  ;;  %299 = vrot.lane.b32.xlu1 %v293_v39, %s741_s27  ;;  %v294_v63 = vsel %vm292_vm9, %v290_v61, %v263_v57 }
  0xdd   : >> { %v261_v51 = vpop.permute.xlu0 %260 }
  0xde   : >> { %v264_v58 = vsel %vm262_vm13, %v259_v46, %v261_v51 }
  0xdf   : >> { %359 = vrot.lane.b32.xlu0 %v293_v39, %s742_s25  ;;  %337 = vrot.lane.b32.xlu1 %v293_v39, %s743_s2  ;;  %v295_v0 = vsel %vm292_vm9, %v291_v62, %v264_v58 }
  0xe3   : >> { %301 = vrot.lane.b32.xlu0 %v294_v63, %s741_s27  ;;  %303 = vrot.lane.b32.xlu1 %v295_v0, %s741_s27  ;;  %s370_s27 = sshra.s32 %s357_s22, 3 }
  0xe7   : >> { %322 = vrot.lane.b32.xlu0 %v295_v0, %s740_s26  ;;  %320 = vrot.lane.b32.xlu1 %v294_v63, %s740_s26  ;;  %s521_s26 = sshll.u32 %s348_s17, 4 }
  0xeb   : >> { %339 = vrot.lane.b32.xlu0 %v294_v63, %s743_s2  ;;  %341 = vrot.lane.b32.xlu1 %v295_v0, %s743_s2  ;;  %s522_s2 = sshll.u32 %s370_s27, 4 }
  0xec   : >> { %s374_s3 = scalar_lea.vmem %s876_s28, %s522_s2 [#allocation5] }
  0xef   : >> { %363 = vrot.lane.b32.xlu0 %v356_v1, %s742_s25  ;;  %361 = vrot.lane.b32.xlu1 %v294_v63, %s742_s25  ;;  %s352_s25 = scalar_lea.vmem %s876_s28, %s521_s26 [#allocation5] }
 0x14d   : >> { %v300_v2 = vpop.permute.xlu1 %299  ;;  %v319_v3 = vpop.permute.xlu0 %318 }
 0x151   : >> { %v338_v4 = vpop.permute.xlu1 %337  ;;  %v360_v5 = vpop.permute.xlu0 %359 }
 0x155   : >> { %v304_v6 = vpop.permute.xlu1 %303  ;;  %v302_v7 = vpop.permute.xlu0 %301 }
 0x156   : >> { %v306_v8 = vsel %vm305_vm14, %v300_v2, %v302_v7  ;;  %v307_v9 = vsel %vm305_vm14, %v302_v7, %v304_v6 }
 0x157   : >> { %315 = vst [vmem:[%s314_s15] sm:$0xff] %v306_v8  ;;  %316 = vst [vmem:[%s314_s15 + $0x8] sm:$0xff] %v307_v9  ;;  %s378_s15 = scalar_lea.sflag (%p154_p8), [#allocation4], %s865_s24 }
 0x159   : >> { %v321_v10 = vpop.permute.xlu1 %320  ;;  %v323_v11 = vpop.permute.xlu0 %322 }
 0x15a   : >> { %v325_v12 = vsel %vm324_vm15, %v319_v3, %v321_v10  ;;  %v326_v13 = vsel %vm324_vm15, %v321_v10, %v323_v11 }
 0x15b   : >> { %334 = vst [vmem:[%s333_s23] sm:$0xff] %v325_v12  ;;  %335 = vst [vmem:[%s333_s23 + $0x8] sm:$0xff] %v326_v13 }
 0x15d   : >> { %v342_v14 = vpop.permute.xlu1 %341  ;;  %v340_v15 = vpop.permute.xlu0 %339  ;;  %156 = sbr.rel (!%p154_p8) target bundleno = 59 (0x3b), region = 81 }
 0x15e   : >> { %v344_v16 = vsel %vm343_vm0, %v338_v4, %v340_v15  ;;  %v345_v17 = vsel %vm343_vm0, %v340_v15, %v342_v14 }
 0x15f   : >> { %353 = vst [vmem:[%s352_s25] sm:$0xff] %v344_v16  ;;  %354 = vst [vmem:[%s352_s25 + $0x8] sm:$0xff] %v345_v17 }
 0x161   : >> { %v362_v18 = vpop.permute.xlu1 %361  ;;  %v364_v19 = vpop.permute.xlu0 %363 }
 0x162   : >> { %v366_v20 = vsel %vm365_vm1, %v360_v5, %v362_v18  ;;  %v367_v21 = vsel %vm365_vm1, %v362_v18, %v364_v19 }
 0x163   : >> { %375 = vst [vmem:[%s374_s3] sm:$0xff] %v366_v20  ;;  %376 = vst [vmem:[%s374_s3 + $0x8] sm:$0xff] %v367_v21 }
 0x164   : > { %653 = shalt.err (!%p650_p5)
}
 0x165   : > { %s654_s28 = scalar_lea.hbm %s949_s12, 8192  ;;  %s658_s23 = scalar_lea.hbm %s1001_s1, 32768 }
 0x166   : > { %p655_p6 = scmp.ne.s32.totalorder %s949_s12, %s654_s28  ;;  %p659_p4 = scmp.lt.u32.totalorder %s949_s12, %s1001_s1 }
 0x167   : > { %p660_p2 = scmp.lt.u32.totalorder %s658_s23, %s654_s28  ;;  %p662_p9 = scmp.lt.u32.totalorder %s654_s28, %s949_s12 }
 0x168   : > { %p656_p7 = pnand %p655_p6, %p1009_p11 }
 0x169   : > { %p661_p8 = por %p660_p2, %p659_p4 }
 0x16a   : > { %p657_p0 = pneg %p656_p7 }
 0x16b   : > { %p663_p13 = por %p662_p9, %p661_p8 }
 0x16d   : > { %p664_p10 = pnand %p663_p13, %p657_p0 }
 0x16f   : > { %667 = shalt.err (!%p664_p10)
}
 0x170   : > { %s745_s25 = smov 256   ;;  %s746_s2 = smov 16  }
 0x171   : > { %529 = dma.vmem_to_hbm [thread:$0]  (%p1009_p11), %s952_s13, 8192, %s949_s12, %s378_s15, %s745_s25, %s745_s25, %s746_s2  }
 0x172 PF: > { %p540_p12 = scmp.ge.s32.totalorder %s726_s11, 2  ;;  %s409_s3 = sand.u32 1, %s706_s6  }
 0x173   : > { %p1010_p1 = scmp.ne.s32.totalorder %s1006_s21, 0  ;;  %s410_s18 = scalar_lea.sflag [#allocation4], %s409_s3 }
 0x175   : > { %p536_p3 = pnand %p540_p12, %p1010_p1 }
 0x177   : > { %701 = dma.done.wait (!%p536_p3), %s410_s18, 8192  }
 0x178   : > { %703 = vsyncadd (!%p536_p3), %s410_s18, 4294959104  ;;  %s17_s11 = sadd.s32 1, %s726_s11   ;;  %s1011_s6 = smov %s710_s7 }
 0x179   : > { %p14_p5 = scmp.ge.s32.totalorder %s17_s11, 6   ;;  %s1012_s7 = smov %s714_s8 }
 0x17a   : > { %s1013_s8 = smov %s813_s20  ;;  %s1014_s9 = smov %s722_s10 }
 0x17b   : > { %s1015_s10 = smov %s1017_s14  ;;  %16 = sbr.rel (!%p14_p5) target bundleno = 6 (0x6), region = 92 }
 0x182   :  { %415 = vsyncpa [#allocation3], 1 }
 0x183   :  { %417 = vsyncpa [#allocation3 + $0x1], 1 }
 0x184   :  { %418 = vsyncpa [#allocation4], 1 }
 0x185   :  { %420 = vsyncpa [#allocation4 + $0x1], 1 }

</bundles_post_ra>
